<compile_context>
chip_gen: v6e
topology: v6e:2x2x1
jax: 0.10.0
libtpu: 0.0.40
codegen_flags: <defaults>
</compile_context>

<pallas_src>
import jax
import jax.numpy as jnp
from jax import lax
from jax.experimental import pallas as pl
from jax.experimental.pallas import tpu as pltpu

_LANES = 128
_SUBLANES = 8


# --------------------------------------------------------------------------
# In-kernel helpers
# --------------------------------------------------------------------------
def _rolled_pair_mask(shape2d, axis, shift, seg=None):
    """Mask (over shape2d) of positions where `pltpu.roll(x, shift, axis) - x`
    pairs two elements exactly `shift` apart along `axis` (excludes the
    circular wrap), independent of the roll-direction convention.
    If `seg` is given (power of two), additionally require both elements to
    lie in the same length-`seg` segment along `axis` (kills cross-fold pairs
    in the lane-folded layout).  Requires shape2d[axis] > 2 * shift."""
    idx = lax.broadcasted_iota(jnp.int32, shape2d, axis)
    ridx = pltpu.roll(idx, shift=shift, axis=axis)
    d = idx - ridx
    mask = (d == shift) | (d == -shift)
    if seg is not None:
        # same segment <=> same value of idx & ~(seg-1); note ~(seg-1) == -seg
        mask = mask & ((idx & (-seg)) == (ridx & (-seg)))
    return mask


def _lane_partial_sum(sq, num_lanes):
    """(P, R, num_lanes) f32 -> (1, 128) per-lane partial sums.
    num_lanes must be a multiple of 128; lanes are folded with static,
    128-aligned slices (no reshape, no cross-lane reduction)."""
    per_lane = sq.sum(axis=0).sum(axis=0, keepdims=True)        # (1, num_lanes)
    acc = per_lane[:, 0:_LANES]
    for k in range(1, num_lanes // _LANES):
        acc = acc + per_lane[:, k * _LANES:(k + 1) * _LANES]
    return acc                                                  # (1, 128)


def _out_tile(h_part, w_part, lane_partial):
    """Build the (1, 8, 128) partial-sum tile: row 0 = H term, row 1 = W term."""
    row = lax.broadcasted_iota(jnp.int32, (1, _SUBLANES, _LANES), 1)
    if lane_partial:
        hv = h_part.reshape(1, 1, _LANES)
        wv = w_part.reshape(1, 1, _LANES)
        return jnp.where(row == 0, hv, jnp.where(row == 1, wv, 0.0))
    col = lax.broadcasted_iota(jnp.int32, (1, _SUBLANES, _LANES), 2)
    return jnp.where((row == 0) & (col == 0), h_part,
                     jnp.where((row == 1) & (col == 0), w_part, 0.0))


# --------------------------------------------------------------------------
# Kernels
# --------------------------------------------------------------------------
def _make_plane_kernel(h, w, roll_h, roll_w):
    """One grid step processes a (P, H, W) block of whole planes."""
    lane_partial = (w % _LANES == 0)

    def kernel(x_ref, out_ref):
        x = x_ref[...]                                   # (P, H, W), native dtype

        # ---- H (vertical) term: fully reduced before W temporaries exist ----
        if h > 1:
            if roll_h:
                dh = (pltpu.roll(x, shift=1, axis=1) - x).astype(jnp.float32)
                hmask = _rolled_pair_mask((h, w), 0, 1)
                dh = jnp.where(hmask[None, :, :], dh, 0.0)
            else:
                dh = (x[:, 1:, :] - x[:, : h - 1, :]).astype(jnp.float32)
            sqh = dh * dh
            h_part = _lane_partial_sum(sqh, w) if lane_partial else jnp.sum(sqh)
        else:
            h_part = (jnp.zeros((1, _LANES), jnp.float32) if lane_partial
                      else jnp.zeros((), jnp.float32))

        # ---- W (horizontal) term ----
        if w > 1:
            if roll_w:
                dw = (pltpu.roll(x, shift=1, axis=2) - x).astype(jnp.float32)
                wmask = _rolled_pair_mask((h, w), 1, 1)
                dw = jnp.where(wmask[None, :, :], dw, 0.0)
            else:
                dw = (x[:, :, 1:] - x[:, :, : w - 1]).astype(jnp.float32)
            sqw = dw * dw
            w_part = _lane_partial_sum(sqw, w) if lane_partial else jnp.sum(sqw)
        else:
            w_part = (jnp.zeros((1, _LANES), jnp.float32) if lane_partial
                      else jnp.zeros((), jnp.float32))

        out_ref[...] = _out_tile(h_part, w_part, lane_partial)

    return kernel


def _make_folded_kernel(h_f, w, num_lanes):
    """Small-W path: each plane was reshaped (for free) from (H, W) to
    (h_f, num_lanes) = (H/g, g*W).  Lane shifts by 1 / W recover all W / H
    neighbor pairs; seam pairs across folded rows use a small slice diff."""

    def kernel(x_ref, out_ref):
        y = x_ref[...]                                   # (P, H/g, g*W), native dtype

        # ---- H (vertical) term ----
        # (a) adjacent original rows folded into the same row: lane shift by W.
        dh = (pltpu.roll(y, shift=w, axis=2) - y).astype(jnp.float32)
        hmask = _rolled_pair_mask((h_f, num_lanes), 1, w)
        dh = jnp.where(hmask[None, :, :], dh, 0.0)
        sqh = dh * dh
        h_part = _lane_partial_sum(sqh, num_lanes)       # (1, 128)
        # (b) seam pairs: last segment of folded row b vs first segment of b+1.
        if h_f > 1:
            seam = (y[:, 1:, 0:w]
                    - y[:, : h_f - 1, num_lanes - w:]).astype(jnp.float32)
            seam_sum = jnp.sum(seam * seam)
            lane1 = lax.broadcasted_iota(jnp.int32, (1, _LANES), 1)
            h_part = h_part + jnp.where(lane1 == 0, seam_sum, 0.0)

        # ---- W (horizontal) term: lane shift by 1, same-segment pairs only ----
        dw = (pltpu.roll(y, shift=1, axis=2) - y).astype(jnp.float32)
        wmask = _rolled_pair_mask((h_f, num_lanes), 1, 1, seg=w)
        dw = jnp.where(wmask[None, :, :], dw, 0.0)
        sqw = dw * dw
        w_part = _lane_partial_sum(sqw, num_lanes)

        out_ref[...] = _out_tile(h_part, w_part, True)

    return kernel


# --------------------------------------------------------------------------
# Wrapper
# --------------------------------------------------------------------------
def _choose_chunking(num_planes, plane_f32_bytes, budget_bytes):
    """Pick planes-per-chunk P and the (possibly zero-padded) chunk count.

    * P capped so one f32 plane block stays inside `budget_bytes`.
    * Chunk count pushed to >= 2 (even when possible) so the "parallel" grid
      axis can use both TensorCores on v7x.
    * The plane count may be padded up to P * num_chunks with zero planes
      (zero planes contribute exactly 0 to both TV sums)."""
    max_p = max(1, budget_bytes // max(1, plane_f32_bytes))
    num_chunks = -(-num_planes // max_p)                 # ceil div
    if num_planes >= 2:
        num_chunks = max(num_chunks, 2)
        if num_chunks % 2:
            num_chunks += 1
    num_chunks = min(num_chunks, num_planes)
    p = -(-num_planes // num_chunks)
    num_chunks = -(-num_planes // p)
    return p, num_chunks, p * num_chunks


def tv_loss_pallas(x, tv_loss_weight=1, block_budget_bytes=4 * 1024 * 1024):
    """TV loss of x: (N, C, H, W), any float dtype.  Returns a scalar (f32).

    block_budget_bytes: per-grid-step f32 plane budget.  4 MiB is safe on
    every TPU generation (v7x: 64 MiB physical VMEM); v5e/v6e (128 MiB VMEM)
    may pass 8 MiB for a few extra % of HBM bandwidth."""
    n, c, h, w = x.shape
    count_h = c * (h - 1) * w            # matches the PyTorch reference
    count_w = c * h * (w - 1)            # (H==1 / W==1 -> NaN, same as reference)

    num_planes = n * c
    itemsize = jnp.dtype(x.dtype).itemsize

    # Small-W lane folding: reinterpret each (H, W) plane as (H/g, g*W) rows
    # (pure reshape of the same HBM bytes) so every vreg's 128 lanes carry
    # data.  Only for a clean power-of-two fold with g >= 4 (W <= 32).
    g = _LANES // w if (0 < w < _LANES and _LANES % w == 0) else 1
    fold = (w > 1) and (g >= 4) and (h % g == 0)
    if fold:
        h_blk, w_blk = h // g, g * w
        kernel = _make_folded_kernel(h_blk, w, w_blk)
    else:
        h_blk, w_blk = h, w
        roll_h = (h > 1) and (h % _SUBLANES == 0) and (itemsize == 4)
        roll_w = (w > 1) and (w % _LANES == 0)
        kernel = _make_plane_kernel(h, w, roll_h, roll_w)

    x_planes = x.reshape(num_planes, h_blk, w_blk)       # free reshape, native dtype

    p, num_chunks, padded = _choose_chunking(num_planes, h * w * 4,
                                             block_budget_bytes)
    if padded != num_planes:
        # Zero planes contribute exactly 0 to both TV sums.
        x_planes = jnp.pad(x_planes, ((0, padded - num_planes), (0, 0), (0, 0)))

    in_block = p * h_blk * w_blk * itemsize
    f32_block = p * h_blk * w_blk * 4
    # Double-buffered input + ~3 live f32 temps (H term retired before the W
    # term is built) + slack; 32 MiB floor is safe on v5e/v6e/v7x.
    vmem_limit = int(min(128 * 1024 * 1024,
                         max(32 * 1024 * 1024,
                             2 * in_block + 3 * f32_block + 2 * 1024 * 1024)))

    partials = pl.pallas_call(
        kernel,
        out_shape=jax.ShapeDtypeStruct((num_chunks, _SUBLANES, _LANES),
                                       jnp.float32),
        grid_spec=pltpu.PrefetchScalarGridSpec(
            num_scalar_prefetch=0,
            grid=(num_chunks,),
            in_specs=[pl.BlockSpec((p, h_blk, w_blk), lambda i: (i, 0, 0))],
            out_specs=pl.BlockSpec((1, _SUBLANES, _LANES), lambda i: (i, 0, 0)),
        ),
        compiler_params=pltpu.CompilerParams(
            dimension_semantics=("parallel",),
            vmem_limit_bytes=vmem_limit,
        ),
    )(x_planes)

    h_tv = jnp.sum(partials[:, 0, :])
    w_tv = jnp.sum(partials[:, 1, :])
    return (2.0 * float(tv_loss_weight) / float(n)) * (h_tv / count_h
                                                       + w_tv / count_w)


def tv_loss_ref(x, tv_loss_weight=1):
    n, c, h, w = x.shape
    count_h = c * (h - 1) * w
    count_w = c * h * (w - 1)
    xf = x.astype(jnp.float32)
    h_tv = jnp.sum((xf[:, :, 1:, :] - xf[:, :, : h - 1, :]) ** 2)
    w_tv = jnp.sum((xf[:, :, :, 1:] - xf[:, :, :, : w - 1]) ** 2)
    return tv_loss_weight * 2.0 * (h_tv / count_h + w_tv / count_w) / n


if __name__ == "__main__":
    key = jax.random.PRNGKey(0)
    cases = [
        # (shape, dtype) -> path exercised
        ((2, 4, 16, 16), jnp.float32),    # lane-folded small-W path (planes -> (2, 128))
        ((1, 3, 16, 256), jnp.float32),   # roll-H + roll-W, zero-padded odd plane count
        ((2, 2, 20, 128), jnp.float32),   # slice-H + roll-W (H not a multiple of 8)
        ((2, 4, 16, 48), jnp.bfloat16),   # unaligned-W slice fallback, bf16 diff-then-upcast
    ]
    for shape, dtype in cases:
        key, sub = jax.random.split(key)
        xin = jax.random.normal(sub, shape, dtype=jnp.float32).astype(dtype)
        out = jax.block_until_ready(tv_loss_pallas(xin, tv_loss_weight=1))
        ref = jax.block_until_ready(tv_loss_ref(xin, tv_loss_weight=1))
        tol = 2e-2 if dtype == jnp.bfloat16 else 1e-4
        assert jnp.allclose(out, ref, rtol=tol, atol=1e-5), (shape, dtype, out, ref)
    print("KERNEL_OK")
</pallas_src>

<mosaic_0001>
module attributes {stable_mosaic.version = 11 : i64} {
  func.func @kernel(%arg0: i32, %arg1: memref<4x2x128xf32, #tpu.memory_space<vmem>>, %arg2: memref<1x8x128xf32, #tpu.memory_space<vmem>>) attributes {dimension_semantics = [#tpu.dimension_semantics<parallel>], iteration_bounds = array<i64: 2>, scalar_prefetch = 0 : i64, scratch_operands = 0 : i64, tpu.core_type = #tpu.core_type<tc>, window_params = [{transform_indices = @transform_0, window_bounds = array<i64: 4, 2, 128>}, {transform_indices = @transform_1, window_bounds = array<i64: 1, 8, 128>}]} {
    %c0 = arith.constant 0 : index
    %c0_0 = arith.constant 0 : index
    %c0_1 = arith.constant 0 : index
    %0 = vector.load %arg1[%c0, %c0_0, %c0_1] : memref<4x2x128xf32, #tpu.memory_space<vmem>>, vector<4x2x128xf32>
    %c16_i32 = arith.constant 16 : i32
    %1 = tpu.dynamic_rotate %0 by %c16_i32 dim 2 : vector<4x2x128xf32>, i32 -> vector<4x2x128xf32>
    %2 = arith.subf %1, %0 : vector<4x2x128xf32>
    %3 = tpu.iota {dimensions = array<i32: 1>} : vector<2x128xi32>
    %c16_i32_2 = arith.constant 16 : i32
    %4 = tpu.dynamic_rotate %3 by %c16_i32_2 dim 1 : vector<2x128xi32>, i32 -> vector<2x128xi32>
    %5 = arith.subi %3, %4 : vector<2x128xi32>
    %c16_i32_3 = arith.constant 16 : i32
    %6 = vector.broadcast %c16_i32_3 : i32 to vector<2x128xi32>
    %7 = arith.cmpi eq, %5, %6 : vector<2x128xi32>
    %c-16_i32 = arith.constant -16 : i32
    %8 = vector.broadcast %c-16_i32 : i32 to vector<2x128xi32>
    %9 = arith.cmpi eq, %5, %8 : vector<2x128xi32>
    %10 = arith.ori %7, %9 : vector<2x128xi1>
    %11 = vector.shape_cast %10 : vector<2x128xi1> to vector<1x2x128xi1>
    %cst = arith.constant 0.000000e+00 : f32
    %12 = vector.shape_cast %11 : vector<1x2x128xi1> to vector<1x2x128xi1>
    %13 = vector.broadcast %12 : vector<1x2x128xi1> to vector<4x2x128xi1>
    %14 = vector.broadcast %cst : f32 to vector<4x2x128xf32>
    %15 = arith.select %13, %2, %14 : vector<4x2x128xi1>, vector<4x2x128xf32>
    %16 = arith.mulf %15, %15 : vector<4x2x128xf32>
    %cst_4 = arith.constant dense<0.000000e+00> : vector<2x128xf32>
    %17 = vector.multi_reduction <add>, %16, %cst_4 [0] : vector<4x2x128xf32> to vector<2x128xf32>
    %cst_5 = arith.constant dense<0.000000e+00> : vector<128xf32>
    %18 = vector.multi_reduction <add>, %17, %cst_5 [0] : vector<2x128xf32> to vector<128xf32>
    %19 = vector.shape_cast %18 : vector<128xf32> to vector<1x128xf32>
    %20 = vector.extract_strided_slice %0 {offsets = [0, 1, 0], sizes = [4, 1, 16], strides = [1, 1, 1]} : vector<4x2x128xf32> to vector<4x1x16xf32>
    %21 = vector.extract_strided_slice %0 {offsets = [0, 0, 112], sizes = [4, 1, 16], strides = [1, 1, 1]} : vector<4x2x128xf32> to vector<4x1x16xf32>
    %22 = arith.subf %20, %21 : vector<4x1x16xf32>
    %23 = arith.mulf %22, %22 : vector<4x1x16xf32>
    %24 = vector.shape_cast %23 : vector<4x1x16xf32> to vector<1x4x1x16xf32>
    %cst_6 = arith.constant dense<0.000000e+00> : vector<1xf32>
    %25 = vector.multi_reduction <add>, %24, %cst_6 [1, 2, 3] : vector<1x4x1x16xf32> to vector<1xf32>
    %26 = vector.shape_cast %25 : vector<1xf32> to vector<1x1x1x1xf32>
    %27 = vector.extract %26[0, 0, 0, 0] : f32 from vector<1x1x1x1xf32>
    %28 = tpu.iota {dimensions = array<i32: 1>} : vector<1x128xi32>
    %c0_i32 = arith.constant 0 : i32
    %29 = vector.broadcast %c0_i32 : i32 to vector<1x128xi32>
    %30 = arith.cmpi eq, %28, %29 : vector<1x128xi32>
    %cst_7 = arith.constant 0.000000e+00 : f32
    %31 = vector.broadcast %27 : f32 to vector<1x128xf32>
    %32 = vector.broadcast %cst_7 : f32 to vector<1x128xf32>
    %33 = arith.select %30, %31, %32 : vector<1x128xi1>, vector<1x128xf32>
    %34 = arith.addf %19, %33 : vector<1x128xf32>
    %c1_i32 = arith.constant 1 : i32
    %35 = tpu.dynamic_rotate %0 by %c1_i32 dim 2 : vector<4x2x128xf32>, i32 -> vector<4x2x128xf32>
    %36 = arith.subf %35, %0 : vector<4x2x128xf32>
    %37 = tpu.iota {dimensions = array<i32: 1>} : vector<2x128xi32>
    %c1_i32_8 = arith.constant 1 : i32
    %38 = tpu.dynamic_rotate %37 by %c1_i32_8 dim 1 : vector<2x128xi32>, i32 -> vector<2x128xi32>
    %39 = arith.subi %37, %38 : vector<2x128xi32>
    %c1_i32_9 = arith.constant 1 : i32
    %40 = vector.broadcast %c1_i32_9 : i32 to vector<2x128xi32>
    %41 = arith.cmpi eq, %39, %40 : vector<2x128xi32>
    %c-1_i32 = arith.constant -1 : i32
    %42 = vector.broadcast %c-1_i32 : i32 to vector<2x128xi32>
    %43 = arith.cmpi eq, %39, %42 : vector<2x128xi32>
    %44 = arith.ori %41, %43 : vector<2x128xi1>
    %c-16_i32_10 = arith.constant -16 : i32
    %45 = vector.broadcast %c-16_i32_10 : i32 to vector<2x128xi32>
    %46 = arith.andi %37, %45 : vector<2x128xi32>
    %c-16_i32_11 = arith.constant -16 : i32
    %47 = vector.broadcast %c-16_i32_11 : i32 to vector<2x128xi32>
    %48 = arith.andi %38, %47 : vector<2x128xi32>
    %49 = arith.cmpi eq, %46, %48 : vector<2x128xi32>
    %50 = arith.andi %44, %49 : vector<2x128xi1>
    %51 = vector.shape_cast %50 : vector<2x128xi1> to vector<1x2x128xi1>
    %cst_12 = arith.constant 0.000000e+00 : f32
    %52 = vector.shape_cast %51 : vector<1x2x128xi1> to vector<1x2x128xi1>
    %53 = vector.broadcast %52 : vector<1x2x128xi1> to vector<4x2x128xi1>
    %54 = vector.broadcast %cst_12 : f32 to vector<4x2x128xf32>
    %55 = arith.select %53, %36, %54 : vector<4x2x128xi1>, vector<4x2x128xf32>
    %56 = arith.mulf %55, %55 : vector<4x2x128xf32>
    %cst_13 = arith.constant dense<0.000000e+00> : vector<2x128xf32>
    %57 = vector.multi_reduction <add>, %56, %cst_13 [0] : vector<4x2x128xf32> to vector<2x128xf32>
    %cst_14 = arith.constant dense<0.000000e+00> : vector<128xf32>
    %58 = vector.multi_reduction <add>, %57, %cst_14 [0] : vector<2x128xf32> to vector<128xf32>
    %59 = vector.shape_cast %58 : vector<128xf32> to vector<1x128xf32>
    %60 = tpu.iota {dimensions = array<i32: 1>} : vector<1x8x128xi32>
    %61 = vector.shape_cast %34 : vector<1x128xf32> to vector<1x1x128xf32>
    %62 = vector.shape_cast %59 : vector<1x128xf32> to vector<1x1x128xf32>
    %c0_i32_15 = arith.constant 0 : i32
    %63 = vector.broadcast %c0_i32_15 : i32 to vector<1x8x128xi32>
    %64 = arith.cmpi eq, %60, %63 : vector<1x8x128xi32>
    %c1_i32_16 = arith.constant 1 : i32
    %65 = vector.broadcast %c1_i32_16 : i32 to vector<1x8x128xi32>
    %66 = arith.cmpi eq, %60, %65 : vector<1x8x128xi32>
    %cst_17 = arith.constant 0.000000e+00 : f32
    %67 = vector.shape_cast %62 : vector<1x1x128xf32> to vector<1x1x128xf32>
    %68 = vector.broadcast %67 : vector<1x1x128xf32> to vector<1x8x128xf32>
    %69 = vector.broadcast %cst_17 : f32 to vector<1x8x128xf32>
    %70 = arith.select %66, %68, %69 : vector<1x8x128xi1>, vector<1x8x128xf32>
    %71 = vector.shape_cast %61 : vector<1x1x128xf32> to vector<1x1x128xf32>
    %72 = vector.broadcast %71 : vector<1x1x128xf32> to vector<1x8x128xf32>
    %73 = arith.select %64, %72, %70 : vector<1x8x128xi1>, vector<1x8x128xf32>
    %c0_18 = arith.constant 0 : index
    %c0_19 = arith.constant 0 : index
    %c0_20 = arith.constant 0 : index
    %74 = vector.load %arg2[%c0_18, %c0_19, %c0_20] : memref<1x8x128xf32, #tpu.memory_space<vmem>>, vector<1x8x128xf32>
    tpu.vector_store %arg2[%c0_18, %c0_19, %c0_20], %73 {strides = array<i32>} : memref<1x8x128xf32, #tpu.memory_space<vmem>>, vector<1x8x128xf32>,
    return
  }
  func.func @transform_0(%arg0: i32) -> (i32, i32, i32) {
    %c0_i32 = arith.constant 0 : i32
    %c0_i32_0 = arith.constant 0 : i32
    %c0_i32_1 = arith.constant 0 : i32
    return %arg0, %c0_i32, %c0_i32_0 : i32, i32, i32
  }
  func.func @transform_1(%arg0: i32) -> (i32, i32, i32) {
    %c0_i32 = arith.constant 0 : i32
    %c0_i32_0 = arith.constant 0 : i32
    %c0_i32_1 = arith.constant 0 : i32
    return %arg0, %c0_i32, %c0_i32_0 : i32, i32, i32
  }
}

</mosaic_0001>

<bundles_post_ra>
// kernel: tpu_custom_call.1
= control target key start
LH: loop header
LB: loop body
LE: loop exit
PB: predicated region body
PF: predicated region fallthrough
CT: control target
= control target key end

     0   :  { %6 = vsyncpa [#allocation3], 0  ;;  %s794_s0 = inlined_call_operand.hbm [shape: f32[8,2,128], index: 0, kind: input, shape index: {}]   ;;  %s795_s1 = inlined_call_operand.hbm [shape: f32[2,8,128], index: 1, kind: output, shape index: {}]  }
   0x1   :  { %8 = vsyncpa [#allocation3 + $0x1], 0 }
   0x2   :  { %9 = vsyncpa [#allocation4], 0 }
   0x3   :  { %11 = vsyncpa [#allocation4 + $0x1], 0  ;;  %s559_s6 = smov 0   ;;  %s561_s7 = smov 0  }
   0x4   :  { %s563_s8 = smov 0   ;;  %s565_s9 = smov 0  }
   0x5 LB: > { %s580_s10 = sadd.s32 4294967295, %s541_s9   ;;  %s383_s11 = sadd.s32 4294967294, %s541_s9   ;;  %s541_s9 = sphi %s565_s9, %s814_s9   ;;  %s537_s8 = sphi %s563_s8, %s813_s8   ;;  %s533_s7 = sphi %s561_s7, %s812_s7   ;;  %s529_s6 = sphi %s559_s6, %s811_s6  }
   0x6   : > { %s584_s12 = sadd.s32 1, %s541_s9   ;;  %s24_s13 = sadd.s32 1, %s537_s8 }
   0x7   : > { %s21_s14 = ssub.s32 %s541_s9, %s584_s12  ;;  %p31_p0 = scmp.ne.s32.totalorder %s537_s8, %s533_s7 }
   0x8   : > { %p22_p1 = scmp.eq.s32.totalorder %s21_s14, 0  ;;  %p32_p2 = scmp.eq.s32.totalorder %s541_s9, 0 }
   0x9   : > { %p37_p3 = scmp.ne.s32.totalorder %s533_s7, %s529_s6  ;;  %p38_p4 = scmp.eq.s32.totalorder %s580_s10, 0 }
   0xa   : > { %s596_s15 = scalar_select %p22_p1, %s537_s8, %s24_s13  }
   0xb   : > { %p598_p5 = por %p32_p2, %p31_p0  ;;  %p602_p6 = por %p38_p4, %p37_p3 }
   0xc   : > { %p61_p7 = scmp.eq.s32.totalorder %s580_s10, 1  ;;  %p67_p8 = scmp.eq.s32.totalorder %s383_s11, 1 }
   0xd   : > { %s799_s17 = scalar_select %p602_p6, 1, 0 }
   0xe   : > { %p411_p10 = scmp.lt.s32.totalorder %s541_s9, 2  ;;  %p609_p11 = por %p61_p7, %p31_p0 }
   0xf   : > { %p613_p12 = por %p67_p8, %p37_p3  ;;  %s87_s20 = sand.u32 1, %s537_s8  }
  0x10   : > { %s800_s18 = scalar_select %p609_p11, 1, 0 }
  0x11   : > { %s801_s19 = scalar_select %p613_p12, 1, 0 }
  0x12   : > { %s396_s21 = sshll.u32 %s541_s9, 7  ;;  %s386_s22 = sshll.u32 %s87_s20, 3 }
  0x13   : > { %s622_s25 = scalar_lea.hbm %s794_s0, %s396_s21  ;;  %s91_s26 = scalar_lea.vmem [#allocation2], %s386_s22 }
  0x14   : > { %s98_s27 = sshll.u32 %s91_s26, 4  ;;  %p626_p13 = pnand %p411_p10, %p598_p5  ;;  %s630_s27 = int_to_ptr.vmem [resolvable:$true] %s98_s27 }
  0x15   : > { %s632_s29 = scalar_lea.sflag [#allocation3], %s87_s20  ;;  %s449_s30 = scalar_lea.hbm %s622_s25, 128 }
  0x16   : > { %p450_p0 = scmp.ne.s32.totalorder %s622_s25, %s449_s30  ;;  %p451_p1 = pneg %p626_p13 }
  0x17   : > { %s454_s4 = scalar_lea.hbm %s794_s0, 256  ;;  %p455_p4 = scmp.lt.s32.totalorder %s622_s25, %s794_s0 }
  0x18   : > { %p452_p2 = pnand %p451_p1, %p450_p0  ;;  %p456_p5 = scmp.lt.s32.totalorder %s454_s4, %s449_s30 }
  0x1a   : > { %p453_p3 = pneg %p452_p2  ;;  %p457_p7 = por %p456_p5, %p455_p4 }
  0x1c   : > { %p458_p8 = pnand %p457_p7, %p453_p3 }
  0x1e   : > { %461 = shalt.err (!%p458_p8)
}
  0x1f   : > { %s462_s13 = scalar_lea.vmem %s630_s27, 128  ;;  %s543_s14 = smov [#allocation2]  }
  0x20   : > { %p463_p10 = scmp.ne.s32.totalorder %s630_s27, %s462_s13  ;;  %s467_s16 = sshll.u32 %s543_s14, 4  ;;  %s468_s16 = int_to_ptr.vmem [resolvable:$false] %s467_s16 }
  0x21   : > { %s469_s20 = scalar_lea.vmem %s468_s16, 256  ;;  %p470_p2 = scmp.lt.s32.totalorder %s630_s27, %s468_s16 }
  0x22   : > { %p465_p9 = pnand %p463_p10, %p451_p1  ;;  %p471_p12 = scmp.lt.s32.totalorder %s469_s20, %s462_s13 }
  0x24   : > { %p466_p0 = pneg %p465_p9  ;;  %p472_p11 = por %p471_p12, %p470_p2 }
  0x26   : > { %p473_p6 = pnand %p472_p11, %p466_p0 }
  0x28   : > { %476 = shalt.err (!%p473_p6)
}
  0x29   : > { %s544_s21 = smov 32   ;;  %s545_s22 = smov 2  }
  0x2a   : > { %406 = dma.hbm_to_vmem [thread:$0]  (!%p626_p13), %s622_s25, 128, %s630_s27, %s632_s29, %s544_s21, %s544_s21, %s545_s22  }
  0x2b   : > { %p389_p9 = scmp.ge.s32.totalorder %s541_s9, 1  ;;  %p106_p1 = scmp.lt.s32.totalorder %s541_s9, 3 }
  0x2d   : > { %p107_p3 = pnand %p389_p9, %p106_p1 }
  0x2e   : > { %s656_s23 = sand.u32 (!%p107_p3), 1, %s533_s7   ;;  %p803_p6 = scmp.ne.s32.totalorder (!%p107_p3), %s799_s17, 0 }
  0x2f   : > { %110 = sbr.rel (%p107_p3) target bundleno = 406 (0x196), region = 24  ;;  %s390_s24 = sshll.u32 (!%p107_p3), %s656_s23, 3 }
  0x30   : > { %s113_s26 = scalar_lea.sflag (!%p107_p3), [#allocation3], %s656_s23  ;;  %s116_s30 = scalar_lea.vmem (!%p107_p3), [#allocation2], %s390_s24 }
  0x34   : > { %520 = dma.done.wait (%p803_p6), %s113_s26, 128  }
  0x35   : > { %522 = vsyncadd (%p803_p6), %s113_s26, 4294967168  ;;  %v666_v0 = vld [vmem:[%s116_s30] sm:$0x3]  ;;  %v668_v1 = vld [vmem:[%s116_s30 + $0x4] sm:$0x3]  ;;  %s546_s25 = smov 16   ;;  %v152_v8 = vlaneseq }
  0x36   : > { %v670_v2 = vld [vmem:[%s116_s30 + $0x2] sm:$0x3]  ;;  %v189_v3 = vrot.slane %v666_v0, 7  ;;  %v191_v4 = vrot.slane %v668_v1, 7  ;;  %v674_v5 = vld [vmem:[%s116_s30 + $0x6] sm:$0x3] }
  0x37   : > { %v190_v6 = vrot.slane %v670_v2, 7  ;;  %v192_v7 = vrot.slane %v674_v5, 7  ;;  %v683_v9 = vand.u32 127, %v152_v8  ;;  %s547_s17 = smov 1   ;;  %vm225_vm0 = vcmask 122880   ;;  %s393_s28 = sshll.u32 %s580_s10, 7 }
  0x38   : > { %193 = vrot.lane.b32.xlu0 %v189_v3, %s546_s25  ;;  %197 = vrot.lane.b32.xlu1 %v191_v4, %s546_s25  ;;  %vm170_vm9 = vcmask 1041408   ;;  %s134_s29 = scalar_lea.vmem [#allocation5], %s390_s24  ;;  %s757_s5 = scalar_lea.hbm %s795_s1, %s393_s28 }
  0x39   : > { %v264_v45 = vand.u32 4294967280, %v683_v9  ;;  %vm242_vm10 = vcmp.eq.s32.totalorder %v683_v9, 0  ;;  %s313_s2 = sshll.u32 %s134_s29, 4  ;;  %s300_s11 = scalar_lea.sflag [#allocation4], %s656_s23  ;;  %s314_s2 = int_to_ptr.vmem [resolvable:$true] %s313_s2 }
  0x3a   : > { %s477_s13 = scalar_lea.vmem %s314_s2, 128  ;;  %p808_p12 = scmp.ne.s32.totalorder %s800_s18, 0 }
  0x3b   : > { %p478_p11 = scmp.ne.s32.totalorder %s314_s2, %s477_s13  ;;  %s548_s10 = smov [#allocation5]  }
  0x3c   : > { %195 = vrot.lane.b32.xlu0 %v190_v6, %s546_s25  ;;  %199 = vrot.lane.b32.xlu1 %v192_v7, %s546_s25  ;;  %s481_s14 = sshll.u32 %s548_s10, 4  ;;  %s482_s14 = int_to_ptr.vmem [resolvable:$false] %s481_s14 }
  0x3d   : > { %p479_p13 = pnand %p478_p11, %p808_p12  ;;  %s483_s16 = scalar_lea.vmem %s482_s14, 256 }
  0x3e   : > { %p484_p5 = scmp.lt.s32.totalorder %s314_s2, %s482_s14  ;;  %p485_p7 = scmp.lt.s32.totalorder %s483_s16, %s477_s13 }
  0x3f   : > { %p480_p4 = pneg %p479_p13 }
  0x40   : > { %154 = vrot.lane.b32.xlu1 %v683_v9, %s546_s25  ;;  %p486_p8 = por %p485_p7, %p484_p5 }
  0x42   : > { %p487_p10 = pnand %p486_p8, %p480_p4 }
  0x44   : > { %258 = vrot.lane.b32.xlu1 %v683_v9, %s547_s17 }
  0x48   : > { %140 = vrot.lane.b32.xlu1 %v666_v0, %s546_s25 }
  0x4c   : > { %142 = vrot.lane.b32.xlu1 %v670_v2, %s546_s25 }
  0x50   : > { %246 = vrot.lane.b32.xlu1 %v666_v0, %s547_s17 }
  0x54   : > { %248 = vrot.lane.b32.xlu1 %v670_v2, %s547_s17 }
  0x58   : > { %144 = vrot.lane.b32.xlu1 %v668_v1, %s546_s25 }
  0x5c   : > { %250 = vrot.lane.b32.xlu1 %v668_v1, %s547_s17 }
  0x60   : > { %252 = vrot.lane.b32.xlu1 %v674_v5, %s547_s17 }
  0xaa   : > { %v194_v10 = vpop.permute.xlu0 %193  ;;  %v198_v11 = vpop.permute.xlu1 %197 }
  0xab   : > { %v205_v12 = vsub.f32 %v666_v0, %v194_v10  ;;  %v207_v13 = vsub.f32 %v668_v1, %v198_v11 }
  0xad   : > { %v209_v14 = vmul.f32 %v205_v12, %v205_v12  ;;  %v211_v17 = vmul.f32 %v207_v13, %v207_v13 }
  0xae   : > { %v196_v15 = vpop.permute.xlu0 %195  ;;  %v200_v16 = vpop.permute.xlu1 %199 }
  0xaf   : > { %v206_v18 = vsub.f32 %v670_v2, %v196_v15  ;;  %v208_v19 = vsub.f32 %v674_v5, %v200_v16  ;;  %v217_v20 = vrot.slane %v209_v14, 1  ;;  %v219_v23 = vrot.slane %v211_v17, 1 }
  0xb1   : > { %v210_v21 = vmul.f32 %v206_v18, %v206_v18  ;;  %v212_v22 = vmul.f32 %v208_v19, %v208_v19  ;;  %v226_v26 = vsel %vm225_vm0, %v217_v20, 0.0  ;;  %v229_v29 = vsel %vm225_vm0, %v219_v23, 0.0 }
  0xb2   : > { %v155_v33 = vpop.permute.xlu1 %154 }
  0xb3   : > { %v218_v24 = vrot.slane %v210_v21, 1  ;;  %v220_v25 = vrot.slane %v212_v22, 1  ;;  %v156_v48 = vsub.s32 %v683_v9, %v155_v33 }
  0xb5   : > { %v227_v27 = vsel %vm225_vm0, %v218_v24, 0.0  ;;  %v231_v30 = vsel %vm225_vm0, %v220_v25, 0.0  ;;  %vm157_vm5 = vcmp.eq.s32.totalorder %v156_v48, 16  ;;  %vm158_vm6 = vcmp.eq.s32.totalorder %v156_v48, 4294967280 }
  0xb6   : > { %v228_v28 = vadd.f32 %v227_v27, %v226_v26  ;;  %v259_v34 = vpop.permute.xlu1 %258  ;;  %vm715_vm8 = vmor %vm157_vm5, %vm158_vm6 }
  0xb7   : > { %v260_v42 = vsub.s32 %v683_v9, %v259_v34  ;;  %v265_v46 = vand.u32 4294967280, %v259_v34 }
  0xb8   : > { %v230_v31 = vadd.f32 %v229_v29, %v228_v28 }
  0xb9   : > { %vm261_vm1 = vcmp.eq.s32.totalorder %v260_v42, 1  ;;  %vm262_vm2 = vcmp.eq.s32.totalorder %v260_v42, 4294967295  ;;  %vm266_vm4 = vcmp.eq.s32.totalorder %v264_v45, %v265_v46 }
  0xba   : > { %v232_v32 = vadd.f32 %v231_v30, %v230_v31  ;;  %v141_v35 = vpop.permute.xlu1 %140  ;;  %vm263_vm3 = vmor %vm261_vm1, %vm262_vm2 }
  0xbb   : > { %vm709_vm7 = vmand %vm263_vm3, %vm266_vm4  ;;  %v148_v55 = vsub.f32 %v141_v35, %v666_v0 }
  0xbc   : > { %233 = vadd.xlane.f32.xlu0 %v232_v32 }
  0xbd   : > { %v162_v61 = vsel %vm715_vm8, %v148_v55, 0.0 }
  0xbe   : > { %v143_v36 = vpop.permute.xlu1 %142  ;;  %v166_v6 = vmul.f32 %v162_v61, %v162_v61 }
  0xbf   : > { %v149_v56 = vsub.f32 %v143_v36, %v670_v2 }
  0xc0   : > { %v171_v16 = vsel %vm170_vm9, %v166_v6, 0.0 }
  0xc1   : > { %v163_v62 = vsel %vm715_vm8, %v149_v56, 0.0 }
  0xc2   : > { %v247_v37 = vpop.permute.xlu1 %246  ;;  %v167_v7 = vmul.f32 %v163_v62, %v163_v62 }
  0xc3   : > { %v254_v52 = vsub.f32 %v247_v37, %v666_v0 }
  0xc4   : > { %v172_v17 = vsel %vm170_vm9, %v167_v7, 0.0 }
  0xc5   : > { %v270_v58 = vsel %vm709_vm7, %v254_v52, 0.0  ;;  %v173_v22 = vadd.f32 %v172_v17, %v171_v16 }
  0xc6   : > { %v249_v38 = vpop.permute.xlu1 %248  ;;  %v274_v3 = vmul.f32 %v270_v58, %v270_v58 }
  0xc7   : > { %v255_v53 = vsub.f32 %v249_v38, %v670_v2 }
  0xc8   : > { %v278_v14 = vsel %vm170_vm9, %v274_v3, 0.0 }
  0xc9   : > { %v271_v59 = vsel %vm709_vm7, %v255_v53, 0.0 }
  0xca   : > { %v145_v44 = vpop.permute.xlu1 %144  ;;  %v275_v4 = vmul.f32 %v271_v59, %v271_v59 }
  0xcb   : > { %v150_v63 = vsub.f32 %v145_v44, %v668_v1  ;;  %v293_v44 = vshrl.u32 %v152_v8, 7 }
  0xcd   : > { %v164_v12 = vsel %vm715_vm8, %v150_v63, 0.0  ;;  %vm295_vm11 = vcmp.eq.s32.totalorder %v293_v44, 1  ;;  %vm294_vm12 = vcmp.eq.s32.totalorder %v293_v44, 0 }
  0xce   : > { %v251_v51 = vpop.permute.xlu1 %250  ;;  %v168_v18 = vmul.f32 %v164_v12, %v164_v12 }
  0xcf   : > { %v256_v60 = vsub.f32 %v251_v51, %v668_v1  ;;  %v279_v1 = vsel %vm170_vm9, %v275_v4, 0.0 }
  0xd0   : > { %v280_v21 = vadd.f32 %v279_v1, %v278_v14  ;;  %v174_v24 = vsel %vm170_vm9, %v168_v18, 0.0 }
  0xd1   : > { %v272_v10 = vsel %vm709_vm7, %v256_v60, 0.0  ;;  %v175_v27 = vadd.f32 %v174_v24, %v173_v22 }
  0xd2   : > { %146 = vrot.lane.b32.xlu0 %v674_v5, %s546_s25  ;;  %v253_v0 = vpop.permute.xlu1 %252  ;;  %v276_v15 = vmul.f32 %v272_v10, %v272_v10 }
  0xd3   : > { %v257_v11 = vsub.f32 %v253_v0, %v674_v5 }
  0xd5   : > { %v273_v19 = vsel %vm709_vm7, %v257_v11, 0.0 }
  0xd6   : > { %v277_v23 = vmul.f32 %v273_v19, %v273_v19 }
  0xd8   : > { %v283_v28 = vsel %vm170_vm9, %v277_v23, 0.0 }
 0x145   : > { %v234_v39 = vpop.xlane.xlu0 %233 }
 0x146   : > { %v235_v40 = vrot.slane %v234_v39, 4 }
 0x148   : > { %v236_v41 = vadd.f32 %v235_v40, %v234_v39 }
 0x149   : > { %v147_v2 = vpop.permute.xlu0 %146 }
 0x14a   : > { %v237_v43 = vrot.slane %v236_v41, 2  ;;  %v151_v13 = vsub.f32 %v147_v2, %v674_v5  ;;  %v281_v5 = vsel %vm170_vm9, %v276_v15, 0.0 }
 0x14b   : > { %v282_v26 = vadd.f32 %v281_v5, %v280_v21 }
 0x14c   : > { %v238_v47 = vadd.f32 %v237_v43, %v236_v41  ;;  %v165_v20 = vsel %vm715_vm8, %v151_v13, 0.0 }
 0x14d   : > { %v169_v25 = vmul.f32 %v165_v20, %v165_v20  ;;  %v284_v30 = vadd.f32 %v283_v28, %v282_v26 }
 0x14e   : > { %v239_v49 = vrot.slane %v238_v47, 1 }
 0x14f   : > { %v176_v29 = vsel %vm170_vm9, %v169_v25, 0.0  ;;  %v285_v32 = vsel %vm170_vm9, %v284_v30, 0.0 }
 0x150   : > { %v240_v50 = vadd.f32 %v239_v49, %v238_v47  ;;  %v177_v31 = vadd.f32 %v176_v29, %v175_v27  ;;  %v286_v34 = vrot.slane %v285_v32, 4 }
 0x152   : > { %397 = vpush %v240_v50  ;;  %v178_v33 = vsel %vm170_vm9, %v177_v31, 0.0  ;;  %v287_v36 = vadd.f32 %v286_v34, %v285_v32 }
 0x153   : > { %v179_v35 = vrot.slane %v178_v33, 4 }
 0x154   : > { %v288_v38 = vrot.slane %v287_v36, 2 }
 0x155   : > { %v180_v37 = vadd.f32 %v179_v35, %v178_v33 }
 0x156   : > { %v289_v40 = vadd.f32 %v288_v38, %v287_v36 }
 0x157   : > { %v181_v39 = vrot.slane %v180_v37, 2 }
 0x158   : > { %v290_v42 = vrot.slane %v289_v40, 1 }
 0x159   : > { %v182_v41 = vadd.f32 %v181_v39, %v180_v37 }
 0x15a   : > { %v291_v45 = vadd.f32 %v290_v42, %v289_v40 }
 0x15b   : > { %v183_v43 = vrot.slane %v182_v41, 1 }
 0x15c   : > { %v296_v50 = vsel %vm295_vm11, %v291_v45, 0.0 }
 0x15d   : > { %v184_v46 = vadd.f32 %v183_v43, %v182_v41 }
 0x183   : > { %s398_s27 = spop %397 }
 0x184   : > { %v243_v47 = vstv %s398_s27 }
 0x185   : > { %v244_v48 = vsel %vm242_vm10, %v243_v47, 0.0 }
 0x186   : > { %v245_v49 = vadd.f32 %v244_v48, %v184_v46 }
 0x188   : > { %v297_v8 = vsel %vm294_vm12, %v245_v49, %v296_v50 }
 0x189   : > { %298 = vst [vmem:[%s134_s29] sm:$0xff] %v297_v8 }
 0x18a   : > { %490 = shalt.err (!%p487_p10)
}
 0x18b   : > { %s491_s20 = scalar_lea.hbm %s757_s5, 128  ;;  %s495_s23 = scalar_lea.hbm %s795_s1, 256 }
 0x18c   : > { %p492_p0 = scmp.ne.s32.totalorder %s757_s5, %s491_s20  ;;  %p496_p1 = scmp.lt.s32.totalorder %s757_s5, %s795_s1 }
 0x18d   : > { %p497_p3 = scmp.lt.s32.totalorder %s495_s23, %s491_s20 }
 0x18e   : > { %p493_p2 = pnand %p492_p0, %p808_p12 }
 0x18f   : > { %p498_p6 = por %p497_p3, %p496_p1 }
 0x190   : > { %p494_p9 = pneg %p493_p2 }
 0x192   : > { %p499_p11 = pnand %p498_p6, %p494_p9 }
 0x194   : > { %502 = shalt.err (!%p499_p11)
}
 0x195   : > { %401 = dma.vmem_to_hbm [thread:$0]  (%p808_p12), %s314_s2, 128, %s757_s5, %s300_s11  }
 0x196 PF: > { %s325_s30 = sand.u32 1, %s529_s6   ;;  %p809_p13 = scmp.ne.s32.totalorder %s801_s19, 0 }
 0x197   : > { %p810_p4 = scmp.ge.s32.totalorder %s541_s9, 2  ;;  %s326_s25 = scalar_lea.sflag [#allocation4], %s325_s30 }
 0x199   : > { %p408_p5 = pnand %p810_p4, %p809_p13 }
 0x19b   : > { %p409_p7 = pneg %p408_p5 }
 0x19d   : > { %524 = dma.done.wait (%p409_p7), %s326_s25, 128  }
 0x19e   : > { %526 = vsyncadd (%p409_p7), %s326_s25, 4294967168  ;;  %p14_p8 = scmp.ge.s32.totalorder %s584_s12, 4   ;;  %s811_s6 = smov %s533_s7 }
 0x19f   : > { %s812_s7 = smov %s537_s8  ;;  %s813_s8 = smov %s596_s15 }
 0x1a0   : > { %s814_s9 = smov %s584_s12  ;;  %16 = sbr.rel (!%p14_p8) target bundleno = 5 (0x5), region = 69 }
 0x1a5   :  { %331 = vsyncpa [#allocation3], 1 }
 0x1a6   :  { %333 = vsyncpa [#allocation3 + $0x1], 1 }
 0x1a7   :  { %334 = vsyncpa [#allocation4], 1 }
 0x1a8   :  { %336 = vsyncpa [#allocation4 + $0x1], 1 }

</bundles_post_ra>
